<compile_context>
chip_gen: v6e
topology: v6e:2x2x1
jax: 0.10.0
libtpu: 0.0.40
codegen_flags: <defaults>
</compile_context>

<pallas_src>
import jax
import jax.numpy as jnp
from jax.experimental import pallas as pl
from jax.experimental.pallas import tpu as pltpu


# ----------------------------------------------------------------------------
# Helpers
# ----------------------------------------------------------------------------
def _round_up(n, m):
    return ((n + m - 1) // m) * m


def _vmem_capacity_bytes():
    """Physical VMEM capacity; conservative 64 MiB (v7x per-core) fallback."""
    try:
        info = pltpu.get_tpu_info()
        cap = getattr(info, "vmem_capacity_bytes", None)
        if cap:
            return int(cap)
    except Exception:
        pass
    return 64 * 1024 * 1024


# ----------------------------------------------------------------------------
# Pallas kernel: fused per-chunk input projection + sequential recurrence
#   pre   = x_chunk @ W_ih + b                    (one MXU matmul per chunk)
#   h_t   = tanh(pre_t + h_{t-1} @ W_hh)          (serial, f32 carry)
# ----------------------------------------------------------------------------
def _rnn_layer_kernel(x_ref, wih_ref, b_ref, whh_ref, h0_ref, out_ref,
                      h_scratch, pre_scratch):
    # Reseed the carried hidden state at the first time chunk of every batch
    # block (time is the innermost grid axis).
    @pl.when(pl.program_id(1) == 0)
    def _():
        h_scratch[...] = jnp.broadcast_to(
            h0_ref[...].astype(jnp.float32), h_scratch.shape
        )

    tc, bblk, hp = out_ref.shape
    dp = x_ref.shape[-1]

    # Chunk-wide input projection on the MXU (independent of the carry, so it
    # is off the serial critical path).  f32 accumulation, bias folded in.
    x2 = x_ref[...].reshape(tc * bblk, dp)
    pre = jnp.dot(x2, wih_ref[...], preferred_element_type=jnp.float32)
    pre = pre + b_ref[...]                                   # (1, Hp) f32 bias
    pre_scratch[...] = pre.reshape(tc, bblk, hp)

    whh = whh_ref[...]                                       # resident (Hp,Hp)
    h = h_scratch[...]                                       # (Bblk, Hp) f32

    def step(i, h):
        pre_t = pre_scratch[i]                               # (Bblk, Hp) f32
        h_new = jnp.tanh(
            pre_t
            + jnp.dot(h.astype(whh.dtype), whh,
                      preferred_element_type=jnp.float32)
        )
        out_ref[i] = h_new.astype(out_ref.dtype)             # lane-dense store
        return h_new

    if tc <= 16:
        # Short chunk: fully unrolled for maximal LLO scheduling freedom.
        for i in range(tc):
            h = step(i, h)
    else:
        # Long chunk: partial unroll bounds instruction memory / live ranges.
        h = jax.lax.fori_loop(0, tc, step, h, unroll=8)

    h_scratch[...] = h


def rnn_layer_pallas(x, w_ih, b, w_hh, h0):
    """One recurrent layer over the full (padded) sequence.

    Args:
      x:    (T, Bp, Dp) time-major, batch/feature-padded input (compute dtype).
      w_ih: (Dp, Hp) padded input projection weight (compute dtype).
      b:    (1, Hp)  padded bias (float32).
      w_hh: (Hp, Hp) padded recurrent weight (compute dtype).
      h0:   (1, Hp)  padded hidden_init row (float32), broadcast in-kernel.
    Returns:
      (T_pad, Bp, Hp) hidden-state sequence (compute dtype), T_pad >= T.
    """
    T, Bp, Dp = x.shape
    Hp = w_hh.shape[0]
    cdt = x.dtype
    cs = jnp.dtype(cdt).itemsize

    # Batch blocking: up to 2 blocks so a batch-parallel axis can use v7x's
    # second TensorCore; harmless (single block) on v5e/v6e or small batches.
    if Bp >= 16 and Bp % 16 == 0:
        Bblk = Bp // 2
    else:
        Bblk = Bp

    # VMEM-aware time-chunk selection.
    capacity = _vmem_capacity_bytes()
    budget = capacity // 2
    fixed = ((Dp * Hp + Hp * Hp) * cs          # resident weights (Buffered(1))
             + 2 * Hp * 4                      # bias + h0 rows
             + Bblk * Hp * 4                   # f32 carry scratch
             + (1 << 20))                      # compiler slack
    per_tc = Bblk * (2 * Dp * cs               # double-buffered x chunk
                     + 2 * Hp * cs             # double-buffered out chunk
                     + Hp * 4)                 # f32 pre scratch
    tc_cap = max(1, (budget - fixed) // per_tc)
    Tc = int(min(T, tc_cap))
    T_pad = _round_up(T, Tc)
    if T_pad != T:
        # Causal recurrence: zero-padded trailing steps never affect real ones.
        x = jnp.pad(x, ((0, T_pad - T), (0, 0), (0, 0)))

    need = int(fixed + per_tc * Tc)
    vmem_limit = int(min(int(0.9 * capacity), max(need + (8 << 20), 32 << 20)))

    grid = (Bp // Bblk, T_pad // Tc)

    cost = pl.CostEstimate(
        flops=int(2 * T_pad * Bp * Hp * Hp + 2 * T_pad * Bp * Dp * Hp),
        transcendentals=int(T_pad * Bp * Hp),
        bytes_accessed=int((T_pad * Bp * (Dp + Hp)) * cs
                           + (Dp * Hp + Hp * Hp) * cs + 2 * Hp * 4),
    )

    resident = pl.Buffered(1)  # block index never changes -> single buffer

    grid_spec = pltpu.PrefetchScalarGridSpec(
        num_scalar_prefetch=0,
        grid=grid,
        in_specs=[
            pl.BlockSpec((Tc, Bblk, Dp), lambda bb, tt: (tt, bb, 0)),   # x chunk
            pl.BlockSpec((Dp, Hp), lambda bb, tt: (0, 0),
                         pipeline_mode=resident),                       # W_ih
            pl.BlockSpec((1, Hp), lambda bb, tt: (0, 0),
                         pipeline_mode=resident),                       # bias
            pl.BlockSpec((Hp, Hp), lambda bb, tt: (0, 0),
                         pipeline_mode=resident),                       # W_hh
            pl.BlockSpec((1, Hp), lambda bb, tt: (0, 0),
                         pipeline_mode=resident),                       # h0 row
        ],
        out_specs=pl.BlockSpec((Tc, Bblk, Hp), lambda bb, tt: (tt, bb, 0)),
        scratch_shapes=[
            pltpu.VMEM((Bblk, Hp), jnp.float32),       # persistent f32 carry
            pltpu.VMEM((Tc, Bblk, Hp), jnp.float32),   # per-chunk projection
        ],
    )

    return pl.pallas_call(
        _rnn_layer_kernel,
        out_shape=jax.ShapeDtypeStruct((T_pad, Bp, Hp), cdt),
        grid_spec=grid_spec,
        compiler_params=pltpu.CompilerParams(
            # batch blocks independent; time is a sequential recurrence
            dimension_semantics=("parallel", "arbitrary"),
            vmem_limit_bytes=vmem_limit,
        ),
        cost_estimate=cost,
    )(x, w_ih, b, w_hh, h0)


# ----------------------------------------------------------------------------
# StackedHiddenState forward (glue in plain JAX).
# ----------------------------------------------------------------------------
def stacked_hidden_state_forward(x, params, hidden_inits,
                                 compute_dtype=jnp.bfloat16):
    """Mirrors StackedHiddenState.forward.

    Args:
      x: (B, T, D) batch-first input (PyTorch convention).
      params: list of (W_ih (d_in, H), W_hh (H, H), b (1, H)) per layer.
      hidden_inits: list of (H,) hidden_init parameters per layer.
      compute_dtype: MXU operand dtype (bf16 recommended on v6e/v7x).
    Returns:
      (x_out (B, T, H_last), [hidden_seq (B, T, H) per layer])
    """
    B, T, _ = x.shape
    Bp = _round_up(B, 8)

    # Time-major once for the whole stack; pad batch to a sublane multiple.
    cur = jnp.transpose(x, (1, 0, 2))                    # (T, B, D)
    cur = jnp.pad(cur, ((0, 0), (0, Bp - B), (0, 0)))    # (T, Bp, D)

    padded_hidden = []
    hidden_dims = []
    for (w_ih, w_hh, b), h_init in zip(params, hidden_inits):
        d_in = cur.shape[-1]                 # possibly padded from prev layer
        d_w, H = w_ih.shape
        Hp = _round_up(H, 128)
        Dp = _round_up(d_in, 128)

        # Zero-pad params so padded channels contribute / receive exactly 0.
        x_l = jnp.pad(cur, ((0, 0), (0, 0), (0, Dp - d_in))).astype(compute_dtype)
        w_ih_p = jnp.zeros((Dp, Hp), compute_dtype).at[:d_w, :H].set(
            w_ih.astype(compute_dtype))
        w_hh_p = jnp.zeros((Hp, Hp), compute_dtype).at[:H, :H].set(
            w_hh.astype(compute_dtype))
        b_p = jnp.zeros((1, Hp), jnp.float32).at[:, :H].set(b.astype(jnp.float32))
        h0_p = jnp.zeros((1, Hp), jnp.float32).at[0, :H].set(
            h_init.astype(jnp.float32))

        # Fused projection + recurrence in Pallas.
        h_seq_p = rnn_layer_pallas(x_l, w_ih_p, b_p, w_hh_p, h0_p)
        h_seq_p = h_seq_p[:T]                # drop any time padding

        cur = h_seq_p                        # stays time-major & padded
        padded_hidden.append(h_seq_p)
        hidden_dims.append(H)

    # Undo padding / layout once, outside the layer loop.
    hidden_list = [
        jnp.transpose(h[:, :B, :Hd], (1, 0, 2)).astype(x.dtype)
        for h, Hd in zip(padded_hidden, hidden_dims)
    ]
    return hidden_list[-1], hidden_list


# ----------------------------------------------------------------------------
# Pure-JAX float32 reference for correctness checking.
# ----------------------------------------------------------------------------
def _ref_forward(x, params, hidden_inits):
    B = x.shape[0]
    hidden_list = []
    for (w_ih, w_hh, b), h_init in zip(params, hidden_inits):
        h0 = jnp.broadcast_to(h_init[None, :], (B, h_init.shape[0]))

        def step(h, x_t, w_ih=w_ih, w_hh=w_hh, b=b):
            h_new = jnp.tanh(x_t @ w_ih + h @ w_hh + b[0])
            return h_new, h_new

        _, h_seq = jax.lax.scan(step, h0, jnp.transpose(x, (1, 0, 2)))
        x = jnp.transpose(h_seq, (1, 0, 2))
        hidden_list.append(x)
    return x, hidden_list


# ----------------------------------------------------------------------------
# Main
# ----------------------------------------------------------------------------
if __name__ == "__main__":
    key = jax.random.PRNGKey(0)

    def build_case(key, B, T, D, H, num_layers):
        key, xk = jax.random.split(key)
        x = jax.random.normal(xk, (B, T, D), dtype=jnp.float32)
        params, hidden_inits = [], []
        for layer in range(num_layers):
            d_in = D if layer == 0 else H
            key, k1, k2, k3, k4 = jax.random.split(key, 5)
            w_ih = 0.1 * jax.random.normal(k1, (d_in, H), dtype=jnp.float32)
            w_hh = 0.1 * jax.random.normal(k2, (H, H), dtype=jnp.float32)
            b = 0.1 * jax.random.normal(k3, (1, H), dtype=jnp.float32)
            h_init = 0.1 * jax.random.normal(k4, (H,), dtype=jnp.float32)
            params.append((w_ih, w_hh, b))
            hidden_inits.append(h_init)
        return key, x, params, hidden_inits

    # Case 1 exercises the fully-unrolled short-chunk path; case 2 exercises
    # the fori_loop path and non-128/non-8-aligned feature/hidden dims.
    for (B, T, D, H, L) in [(2, 8, 32, 32, 3), (2, 40, 24, 48, 2)]:
        key, x, params, hidden_inits = build_case(key, B, T, D, H, L)

        out, hiddens = stacked_hidden_state_forward(x, params, hidden_inits)
        out = jax.block_until_ready(out)
        hiddens = [jax.block_until_ready(h) for h in hiddens]

        out_ref, hiddens_ref = _ref_forward(x, params, hidden_inits)

        assert out.shape == (B, T, H)
        assert len(hiddens) == L
        # bf16 MXU operands with f32 accumulation -> relaxed tolerance.
        for h, h_ref in zip(hiddens, hiddens_ref):
            assert h.shape == h_ref.shape
            assert jnp.allclose(h, h_ref, atol=5e-2, rtol=5e-2), float(
                jnp.max(jnp.abs(h - h_ref)))
        assert jnp.allclose(out, out_ref, atol=5e-2, rtol=5e-2)

    print("KERNEL_OK")
</pallas_src>

<mosaic_0001>
module attributes {stable_mosaic.version = 11 : i64} {
  func.func @_rnn_layer_kernel(%arg0: i32, %arg1: i32, %arg2: memref<8x8x128xbf16, #tpu.memory_space<vmem>>, %arg3: memref<128x128xbf16, #tpu.memory_space<vmem>>, %arg4: memref<1x128xf32, #tpu.memory_space<vmem>>, %arg5: memref<128x128xbf16, #tpu.memory_space<vmem>>, %arg6: memref<1x128xf32, #tpu.memory_space<vmem>>, %arg7: memref<8x8x128xbf16, #tpu.memory_space<vmem>>, %arg8: memref<8x128xf32, #tpu.memory_space<vmem>>, %arg9: memref<8x8x128xf32, #tpu.memory_space<vmem>>) attributes {dimension_semantics = [#tpu.dimension_semantics<parallel>, #tpu.dimension_semantics<arbitrary>], iteration_bounds = array<i64: 1, 1>, scalar_prefetch = 0 : i64, scratch_operands = 2 : i64, tpu.core_type = #tpu.core_type<tc>, window_params = [{transform_indices = @transform_0, window_bounds = array<i64: 8, 8, 128>}, {pipeline_mode = #tpu.pipeline_mode<synchronous>, transform_indices = @transform_1, window_bounds = array<i64: 128, 128>}, {pipeline_mode = #tpu.pipeline_mode<synchronous>, transform_indices = @transform_2, window_bounds = array<i64: 1, 128>}, {pipeline_mode = #tpu.pipeline_mode<synchronous>, transform_indices = @transform_3, window_bounds = array<i64: 128, 128>}, {pipeline_mode = #tpu.pipeline_mode<synchronous>, transform_indices = @transform_4, window_bounds = array<i64: 1, 128>}, {transform_indices = @transform_5, window_bounds = array<i64: 8, 8, 128>}]} {
    %c0_i32 = arith.constant 0 : i32
    %0 = arith.cmpi eq, %arg1, %c0_i32 : i32
    %1 = arith.extui %0 : i1 to i32
    %c0_i32_0 = arith.constant 0 : i32
    %2 = arith.cmpi ne, %1, %c0_i32_0 : i32
    scf.if %2 {
      %c0_65 = arith.constant 0 : index
      %c0_66 = arith.constant 0 : index
      %95 = vector.load %arg6[%c0_65, %c0_66] : memref<1x128xf32, #tpu.memory_space<vmem>>, vector<1x128xf32>
      %96 = vector.shape_cast %95 : vector<1x128xf32> to vector<1x128xf32>
      %97 = vector.broadcast %96 : vector<1x128xf32> to vector<8x128xf32>
      %c0_67 = arith.constant 0 : index
      %c0_68 = arith.constant 0 : index
      %98 = vector.load %arg8[%c0_67, %c0_68] : memref<8x128xf32, #tpu.memory_space<vmem>>, vector<8x128xf32>
      tpu.vector_store %arg8[%c0_67, %c0_68], %97 {strides = array<i32>} : memref<8x128xf32, #tpu.memory_space<vmem>>, vector<8x128xf32>,
    } else {
    }
    %c0 = arith.constant 0 : index
    %c0_1 = arith.constant 0 : index
    %c0_2 = arith.constant 0 : index
    %3 = vector.load %arg2[%c0, %c0_1, %c0_2] : memref<8x8x128xbf16, #tpu.memory_space<vmem>>, vector<8x8x128xbf16>
    %4 = vector.shape_cast %3 : vector<8x8x128xbf16> to vector<64x128xbf16>
    %c0_3 = arith.constant 0 : index
    %c0_4 = arith.constant 0 : index
    %5 = vector.load %arg3[%c0_3, %c0_4] : memref<128x128xbf16, #tpu.memory_space<vmem>>, vector<128x128xbf16>
    %cst = arith.constant dense<0.000000e+00> : vector<64x128xf32>
    %6 = tpu.matmul %4, %5, %cst {dimension_numbers = #tpu.dot_dimension_numbers<[1], [0], [0], [1], [0, 0, 1, 1], [], []>} : vector<64x128xbf16>, vector<128x128xbf16>, vector<64x128xf32> -> vector<64x128xf32>
    %c0_5 = arith.constant 0 : index
    %c0_6 = arith.constant 0 : index
    %7 = vector.load %arg4[%c0_5, %c0_6] : memref<1x128xf32, #tpu.memory_space<vmem>>, vector<1x128xf32>
    %8 = vector.broadcast %7 : vector<1x128xf32> to vector<64x128xf32>
    %9 = arith.addf %6, %8 : vector<64x128xf32>
    %10 = vector.shape_cast %9 : vector<64x128xf32> to vector<8x8x128xf32>
    %c0_7 = arith.constant 0 : index
    %c0_8 = arith.constant 0 : index
    %c0_9 = arith.constant 0 : index
    %11 = vector.load %arg9[%c0_7, %c0_8, %c0_9] : memref<8x8x128xf32, #tpu.memory_space<vmem>>, vector<8x8x128xf32>
    tpu.vector_store %arg9[%c0_7, %c0_8, %c0_9], %10 {strides = array<i32>} : memref<8x8x128xf32, #tpu.memory_space<vmem>>, vector<8x8x128xf32>,
    %c0_10 = arith.constant 0 : index
    %c0_11 = arith.constant 0 : index
    %12 = vector.load %arg5[%c0_10, %c0_11] : memref<128x128xbf16, #tpu.memory_space<vmem>>, vector<128x128xbf16>
    %c0_12 = arith.constant 0 : index
    %c0_13 = arith.constant 0 : index
    %13 = vector.load %arg8[%c0_12, %c0_13] : memref<8x128xf32, #tpu.memory_space<vmem>>, vector<8x128xf32>
    %c0_14 = arith.constant 0 : index
    %c0_15 = arith.constant 0 : index
    %c0_16 = arith.constant 0 : index
    %14 = vector.load %arg9[%c0_14, %c0_15, %c0_16] : memref<8x8x128xf32, #tpu.memory_space<vmem>>, vector<1x8x128xf32>
    %15 = vector.shape_cast %14 : vector<1x8x128xf32> to vector<8x128xf32>
    %16 = arith.truncf %13 : vector<8x128xf32> to vector<8x128xbf16>
    %cst_17 = arith.constant dense<0.000000e+00> : vector<8x128xf32>
    %17 = tpu.matmul %16, %12, %cst_17 {dimension_numbers = #tpu.dot_dimension_numbers<[1], [0], [0], [1], [0, 0, 1, 1], [], []>} : vector<8x128xbf16>, vector<128x128xbf16>, vector<8x128xf32> -> vector<8x128xf32>
    %18 = arith.addf %15, %17 : vector<8x128xf32>
    %19 = math.tanh %18 : vector<8x128xf32>
    %20 = arith.truncf %19 : vector<8x128xf32> to vector<8x128xbf16>
    %c0_18 = arith.constant 0 : index
    %c0_19 = arith.constant 0 : index
    %c0_20 = arith.constant 0 : index
    %21 = vector.load %arg7[%c0_18, %c0_19, %c0_20] : memref<8x8x128xbf16, #tpu.memory_space<vmem>>, vector<1x8x128xbf16>
    %22 = vector.shape_cast %21 : vector<1x8x128xbf16> to vector<8x128xbf16>
    %23 = vector.shape_cast %20 : vector<8x128xbf16> to vector<1x8x128xbf16>
    tpu.vector_store %arg7[%c0_18, %c0_19, %c0_20], %23 {strides = array<i32>} : memref<8x8x128xbf16, #tpu.memory_space<vmem>>, vector<1x8x128xbf16>,
    %c1 = arith.constant 1 : index
    %c0_21 = arith.constant 0 : index
    %c0_22 = arith.constant 0 : index
    %24 = vector.load %arg9[%c1, %c0_21, %c0_22] : memref<8x8x128xf32, #tpu.memory_space<vmem>>, vector<1x8x128xf32>
    %25 = vector.shape_cast %24 : vector<1x8x128xf32> to vector<8x128xf32>
    %26 = arith.truncf %19 : vector<8x128xf32> to vector<8x128xbf16>
    %cst_23 = arith.constant dense<0.000000e+00> : vector<8x128xf32>
    %27 = tpu.matmul %26, %12, %cst_23 {dimension_numbers = #tpu.dot_dimension_numbers<[1], [0], [0], [1], [0, 0, 1, 1], [], []>} : vector<8x128xbf16>, vector<128x128xbf16>, vector<8x128xf32> -> vector<8x128xf32>
    %28 = arith.addf %25, %27 : vector<8x128xf32>
    %29 = math.tanh %28 : vector<8x128xf32>
    %30 = arith.truncf %29 : vector<8x128xf32> to vector<8x128xbf16>
    %c1_24 = arith.constant 1 : index
    %c0_25 = arith.constant 0 : index
    %c0_26 = arith.constant 0 : index
    %31 = vector.load %arg7[%c1_24, %c0_25, %c0_26] : memref<8x8x128xbf16, #tpu.memory_space<vmem>>, vector<1x8x128xbf16>
    %32 = vector.shape_cast %31 : vector<1x8x128xbf16> to vector<8x128xbf16>
    %33 = vector.shape_cast %30 : vector<8x128xbf16> to vector<1x8x128xbf16>
    tpu.vector_store %arg7[%c1_24, %c0_25, %c0_26], %33 {strides = array<i32>} : memref<8x8x128xbf16, #tpu.memory_space<vmem>>, vector<1x8x128xbf16>,
    %c2 = arith.constant 2 : index
    %c0_27 = arith.constant 0 : index
    %c0_28 = arith.constant 0 : index
    %34 = vector.load %arg9[%c2, %c0_27, %c0_28] : memref<8x8x128xf32, #tpu.memory_space<vmem>>, vector<1x8x128xf32>
    %35 = vector.shape_cast %34 : vector<1x8x128xf32> to vector<8x128xf32>
    %36 = arith.truncf %29 : vector<8x128xf32> to vector<8x128xbf16>
    %cst_29 = arith.constant dense<0.000000e+00> : vector<8x128xf32>
    %37 = tpu.matmul %36, %12, %cst_29 {dimension_numbers = #tpu.dot_dimension_numbers<[1], [0], [0], [1], [0, 0, 1, 1], [], []>} : vector<8x128xbf16>, vector<128x128xbf16>, vector<8x128xf32> -> vector<8x128xf32>
    %38 = arith.addf %35, %37 : vector<8x128xf32>
    %39 = math.tanh %38 : vector<8x128xf32>
    %40 = arith.truncf %39 : vector<8x128xf32> to vector<8x128xbf16>
    %c2_30 = arith.constant 2 : index
    %c0_31 = arith.constant 0 : index
    %c0_32 = arith.constant 0 : index
    %41 = vector.load %arg7[%c2_30, %c0_31, %c0_32] : memref<8x8x128xbf16, #tpu.memory_space<vmem>>, vector<1x8x128xbf16>
    %42 = vector.shape_cast %41 : vector<1x8x128xbf16> to vector<8x128xbf16>
    %43 = vector.shape_cast %40 : vector<8x128xbf16> to vector<1x8x128xbf16>
    tpu.vector_store %arg7[%c2_30, %c0_31, %c0_32], %43 {strides = array<i32>} : memref<8x8x128xbf16, #tpu.memory_space<vmem>>, vector<1x8x128xbf16>,
    %c3 = arith.constant 3 : index
    %c0_33 = arith.constant 0 : index
    %c0_34 = arith.constant 0 : index
    %44 = vector.load %arg9[%c3, %c0_33, %c0_34] : memref<8x8x128xf32, #tpu.memory_space<vmem>>, vector<1x8x128xf32>
    %45 = vector.shape_cast %44 : vector<1x8x128xf32> to vector<8x128xf32>
    %46 = arith.truncf %39 : vector<8x128xf32> to vector<8x128xbf16>
    %cst_35 = arith.constant dense<0.000000e+00> : vector<8x128xf32>
    %47 = tpu.matmul %46, %12, %cst_35 {dimension_numbers = #tpu.dot_dimension_numbers<[1], [0], [0], [1], [0, 0, 1, 1], [], []>} : vector<8x128xbf16>, vector<128x128xbf16>, vector<8x128xf32> -> vector<8x128xf32>
    %48 = arith.addf %45, %47 : vector<8x128xf32>
    %49 = math.tanh %48 : vector<8x128xf32>
    %50 = arith.truncf %49 : vector<8x128xf32> to vector<8x128xbf16>
    %c3_36 = arith.constant 3 : index
    %c0_37 = arith.constant 0 : index
    %c0_38 = arith.constant 0 : index
    %51 = vector.load %arg7[%c3_36, %c0_37, %c0_38] : memref<8x8x128xbf16, #tpu.memory_space<vmem>>, vector<1x8x128xbf16>
    %52 = vector.shape_cast %51 : vector<1x8x128xbf16> to vector<8x128xbf16>
    %53 = vector.shape_cast %50 : vector<8x128xbf16> to vector<1x8x128xbf16>
    tpu.vector_store %arg7[%c3_36, %c0_37, %c0_38], %53 {strides = array<i32>} : memref<8x8x128xbf16, #tpu.memory_space<vmem>>, vector<1x8x128xbf16>,
    %c4 = arith.constant 4 : index
    %c0_39 = arith.constant 0 : index
    %c0_40 = arith.constant 0 : index
    %54 = vector.load %arg9[%c4, %c0_39, %c0_40] : memref<8x8x128xf32, #tpu.memory_space<vmem>>, vector<1x8x128xf32>
    %55 = vector.shape_cast %54 : vector<1x8x128xf32> to vector<8x128xf32>
    %56 = arith.truncf %49 : vector<8x128xf32> to vector<8x128xbf16>
    %cst_41 = arith.constant dense<0.000000e+00> : vector<8x128xf32>
    %57 = tpu.matmul %56, %12, %cst_41 {dimension_numbers = #tpu.dot_dimension_numbers<[1], [0], [0], [1], [0, 0, 1, 1], [], []>} : vector<8x128xbf16>, vector<128x128xbf16>, vector<8x128xf32> -> vector<8x128xf32>
    %58 = arith.addf %55, %57 : vector<8x128xf32>
    %59 = math.tanh %58 : vector<8x128xf32>
    %60 = arith.truncf %59 : vector<8x128xf32> to vector<8x128xbf16>
    %c4_42 = arith.constant 4 : index
    %c0_43 = arith.constant 0 : index
    %c0_44 = arith.constant 0 : index
    %61 = vector.load %arg7[%c4_42, %c0_43, %c0_44] : memref<8x8x128xbf16, #tpu.memory_space<vmem>>, vector<1x8x128xbf16>
    %62 = vector.shape_cast %61 : vector<1x8x128xbf16> to vector<8x128xbf16>
    %63 = vector.shape_cast %60 : vector<8x128xbf16> to vector<1x8x128xbf16>
    tpu.vector_store %arg7[%c4_42, %c0_43, %c0_44], %63 {strides = array<i32>} : memref<8x8x128xbf16, #tpu.memory_space<vmem>>, vector<1x8x128xbf16>,
    %c5 = arith.constant 5 : index
    %c0_45 = arith.constant 0 : index
    %c0_46 = arith.constant 0 : index
    %64 = vector.load %arg9[%c5, %c0_45, %c0_46] : memref<8x8x128xf32, #tpu.memory_space<vmem>>, vector<1x8x128xf32>
    %65 = vector.shape_cast %64 : vector<1x8x128xf32> to vector<8x128xf32>
    %66 = arith.truncf %59 : vector<8x128xf32> to vector<8x128xbf16>
    %cst_47 = arith.constant dense<0.000000e+00> : vector<8x128xf32>
    %67 = tpu.matmul %66, %12, %cst_47 {dimension_numbers = #tpu.dot_dimension_numbers<[1], [0], [0], [1], [0, 0, 1, 1], [], []>} : vector<8x128xbf16>, vector<128x128xbf16>, vector<8x128xf32> -> vector<8x128xf32>
    %68 = arith.addf %65, %67 : vector<8x128xf32>
    %69 = math.tanh %68 : vector<8x128xf32>
    %70 = arith.truncf %69 : vector<8x128xf32> to vector<8x128xbf16>
    %c5_48 = arith.constant 5 : index
    %c0_49 = arith.constant 0 : index
    %c0_50 = arith.constant 0 : index
    %71 = vector.load %arg7[%c5_48, %c0_49, %c0_50] : memref<8x8x128xbf16, #tpu.memory_space<vmem>>, vector<1x8x128xbf16>
    %72 = vector.shape_cast %71 : vector<1x8x128xbf16> to vector<8x128xbf16>
    %73 = vector.shape_cast %70 : vector<8x128xbf16> to vector<1x8x128xbf16>
    tpu.vector_store %arg7[%c5_48, %c0_49, %c0_50], %73 {strides = array<i32>} : memref<8x8x128xbf16, #tpu.memory_space<vmem>>, vector<1x8x128xbf16>,
    %c6 = arith.constant 6 : index
    %c0_51 = arith.constant 0 : index
    %c0_52 = arith.constant 0 : index
    %74 = vector.load %arg9[%c6, %c0_51, %c0_52] : memref<8x8x128xf32, #tpu.memory_space<vmem>>, vector<1x8x128xf32>
    %75 = vector.shape_cast %74 : vector<1x8x128xf32> to vector<8x128xf32>
    %76 = arith.truncf %69 : vector<8x128xf32> to vector<8x128xbf16>
    %cst_53 = arith.constant dense<0.000000e+00> : vector<8x128xf32>
    %77 = tpu.matmul %76, %12, %cst_53 {dimension_numbers = #tpu.dot_dimension_numbers<[1], [0], [0], [1], [0, 0, 1, 1], [], []>} : vector<8x128xbf16>, vector<128x128xbf16>, vector<8x128xf32> -> vector<8x128xf32>
    %78 = arith.addf %75, %77 : vector<8x128xf32>
    %79 = math.tanh %78 : vector<8x128xf32>
    %80 = arith.truncf %79 : vector<8x128xf32> to vector<8x128xbf16>
    %c6_54 = arith.constant 6 : index
    %c0_55 = arith.constant 0 : index
    %c0_56 = arith.constant 0 : index
    %81 = vector.load %arg7[%c6_54, %c0_55, %c0_56] : memref<8x8x128xbf16, #tpu.memory_space<vmem>>, vector<1x8x128xbf16>
    %82 = vector.shape_cast %81 : vector<1x8x128xbf16> to vector<8x128xbf16>
    %83 = vector.shape_cast %80 : vector<8x128xbf16> to vector<1x8x128xbf16>
    tpu.vector_store %arg7[%c6_54, %c0_55, %c0_56], %83 {strides = array<i32>} : memref<8x8x128xbf16, #tpu.memory_space<vmem>>, vector<1x8x128xbf16>,
    %c7 = arith.constant 7 : index
    %c0_57 = arith.constant 0 : index
    %c0_58 = arith.constant 0 : index
    %84 = vector.load %arg9[%c7, %c0_57, %c0_58] : memref<8x8x128xf32, #tpu.memory_space<vmem>>, vector<1x8x128xf32>
    %85 = vector.shape_cast %84 : vector<1x8x128xf32> to vector<8x128xf32>
    %86 = arith.truncf %79 : vector<8x128xf32> to vector<8x128xbf16>
    %cst_59 = arith.constant dense<0.000000e+00> : vector<8x128xf32>
    %87 = tpu.matmul %86, %12, %cst_59 {dimension_numbers = #tpu.dot_dimension_numbers<[1], [0], [0], [1], [0, 0, 1, 1], [], []>} : vector<8x128xbf16>, vector<128x128xbf16>, vector<8x128xf32> -> vector<8x128xf32>
    %88 = arith.addf %85, %87 : vector<8x128xf32>
    %89 = math.tanh %88 : vector<8x128xf32>
    %90 = arith.truncf %89 : vector<8x128xf32> to vector<8x128xbf16>
    %c7_60 = arith.constant 7 : index
    %c0_61 = arith.constant 0 : index
    %c0_62 = arith.constant 0 : index
    %91 = vector.load %arg7[%c7_60, %c0_61, %c0_62] : memref<8x8x128xbf16, #tpu.memory_space<vmem>>, vector<1x8x128xbf16>
    %92 = vector.shape_cast %91 : vector<1x8x128xbf16> to vector<8x128xbf16>
    %93 = vector.shape_cast %90 : vector<8x128xbf16> to vector<1x8x128xbf16>
    tpu.vector_store %arg7[%c7_60, %c0_61, %c0_62], %93 {strides = array<i32>} : memref<8x8x128xbf16, #tpu.memory_space<vmem>>, vector<1x8x128xbf16>,
    %c0_63 = arith.constant 0 : index
    %c0_64 = arith.constant 0 : index
    %94 = vector.load %arg8[%c0_63, %c0_64] : memref<8x128xf32, #tpu.memory_space<vmem>>, vector<8x128xf32>
    tpu.vector_store %arg8[%c0_63, %c0_64], %89 {strides = array<i32>} : memref<8x128xf32, #tpu.memory_space<vmem>>, vector<8x128xf32>,
    return
  }
  func.func @transform_0(%arg0: i32, %arg1: i32) -> (i32, i32, i32) {
    %c0_i32 = arith.constant 0 : i32
    %c0_i32_0 = arith.constant 0 : i32
    return %arg1, %arg0, %c0_i32 : i32, i32, i32
  }
  func.func @transform_1(%arg0: i32, %arg1: i32) -> (i32, i32) {
    %c0_i32 = arith.constant 0 : i32
    %c0_i32_0 = arith.constant 0 : i32
    %c0_i32_1 = arith.constant 0 : i32
    return %c0_i32, %c0_i32_0 : i32, i32
  }
  func.func @transform_2(%arg0: i32, %arg1: i32) -> (i32, i32) {
    %c0_i32 = arith.constant 0 : i32
    %c0_i32_0 = arith.constant 0 : i32
    %c0_i32_1 = arith.constant 0 : i32
    return %c0_i32, %c0_i32_0 : i32, i32
  }
  func.func @transform_3(%arg0: i32, %arg1: i32) -> (i32, i32) {
    %c0_i32 = arith.constant 0 : i32
    %c0_i32_0 = arith.constant 0 : i32
    %c0_i32_1 = arith.constant 0 : i32
    return %c0_i32, %c0_i32_0 : i32, i32
  }
  func.func @transform_4(%arg0: i32, %arg1: i32) -> (i32, i32) {
    %c0_i32 = arith.constant 0 : i32
    %c0_i32_0 = arith.constant 0 : i32
    %c0_i32_1 = arith.constant 0 : i32
    return %c0_i32, %c0_i32_0 : i32, i32
  }
  func.func @transform_5(%arg0: i32, %arg1: i32) -> (i32, i32, i32) {
    %c0_i32 = arith.constant 0 : i32
    %c0_i32_0 = arith.constant 0 : i32
    return %arg1, %arg0, %c0_i32 : i32, i32, i32
  }
}

</mosaic_0001>

<bundles_post_ra>
// kernel: tpu_custom_call.1
= control target key start
LH: loop header
LB: loop body
LE: loop exit
PB: predicated region body
PF: predicated region fallthrough
CT: control target
= control target key end

     0   :  { %10 = vsyncpa [#allocation5], 0  ;;  %s1383_s0 = inlined_call_operand.hbm [shape: bf16[8,8,128], index: 0, kind: input, shape index: {}]   ;;  %s1384_s1 = inlined_call_operand.hbm [shape: bf16[128,128], index: 1, kind: input, shape index: {}]   ;;  %s1385_s2 = inlined_call_operand.vmem [shape: f32[1,128], index: 2, kind: input, shape index: {}]   ;;  %s1386_s3 = inlined_call_operand.hbm [shape: bf16[128,128], index: 3, kind: input, shape index: {}]   ;;  %s1387_s4 = inlined_call_operand.vmem [shape: f32[1,128], index: 4, kind: input, shape index: {}]   ;;  %s1388_s5 = inlined_call_operand.hbm [shape: bf16[8,8,128], index: 5, kind: output, shape index: {}]  }
   0x1   :  { %11 = vsyncpa [#allocation8], 0 }
   0x2   :  { %12 = vsyncpa [#allocation6], 0  ;;  %s1130_s18 = smov [#allocation7]   ;;  %s1131_s20 = smov [#allocation4]  }
   0x3   :  { %s30_s19 = sshll.u32 %s1130_s18, 4  ;;  %s18_s21 = sshll.u32 %s1131_s20, 4  ;;  %s31_s19 = int_to_ptr.vmem [resolvable:$true] %s30_s19  ;;  %s19_s21 = int_to_ptr.vmem [resolvable:$true] %s18_s21 }
   0x4   :  { %s1052_s22 = scalar_lea.vmem %s31_s19, 1024  ;;  %p1057_p1 = scmp.lt.s32.totalorder %s31_s19, %s31_s19 }
   0x5   :  { %p1053_p0 = scmp.ne.s32.totalorder %s31_s19, %s1052_s22  ;;  %p1058_p2 = scmp.lt.s32.totalorder %s1052_s22, %s1052_s22 }
   0x7   :  { %p1059_p3 = por %p1058_p2, %p1057_p1 }
   0x9   :  { %p1060_p4 = pnand %p1059_p3, %p1053_p0 }
   0xb   :  { %1063 = shalt.err (!%p1060_p4)
}
   0xc   :  { %s1132_s23 = smov 64   ;;  %s1133_s24 = smov 4  }
   0xd   :  { %36 = dma.hbm_to_vmem [thread:$0]  %s1384_s1, 1024, %s31_s19, [#allocation8], %s1132_s23, %s1132_s23, %s1133_s24  }
   0xe   :  { %s1072_s27 = scalar_lea.vmem %s19_s21, 512  ;;  %p1077_p6 = scmp.lt.s32.totalorder %s19_s21, %s19_s21 }
   0xf   :  { %p1073_p5 = scmp.ne.s32.totalorder %s19_s21, %s1072_s27  ;;  %p1078_p7 = scmp.lt.s32.totalorder %s1072_s27, %s1072_s27 }
  0x11   :  { %p1079_p8 = por %p1078_p7, %p1077_p6 }
  0x13   :  { %p1080_p9 = pnand %p1079_p8, %p1073_p5 }
  0x15   :  { %1083 = shalt.err (!%p1080_p9)
}
  0x16   :  { %24 = dma.hbm_to_vmem [thread:$0]  %s1383_s0, 512, %s19_s21, [#allocation5], %s1132_s23, %s1132_s23, %s1133_s24  }
  0x17   :  { %s1134_s30 = smov [#allocation9]  }
  0x18   :  { %s44_s6 = sshll.u32 %s1134_s30, 4  ;;  %s45_s6 = int_to_ptr.vmem [resolvable:$true] %s44_s6 }
  0x19   :  { %s1092_s7 = scalar_lea.vmem %s45_s6, 1024  ;;  %p1097_p11 = scmp.lt.s32.totalorder %s45_s6, %s45_s6 }
  0x1a   :  { %p1093_p10 = scmp.ne.s32.totalorder %s45_s6, %s1092_s7  ;;  %p1098_p12 = scmp.lt.s32.totalorder %s1092_s7, %s1092_s7 }
  0x1c   :  { %p1099_p13 = por %p1098_p12, %p1097_p11 }
  0x1e   :  { %p1100_p0 = pnand %p1099_p13, %p1093_p10 }
  0x20   :  { %1103 = shalt.err (!%p1100_p0)
}
  0x21   :  { %50 = dma.hbm_to_vmem [thread:$0]  %s1386_s3, 1024, %s45_s6, [#allocation8], %s1132_s23, %s1132_s23, %s1133_s24  }
  0x22   :  { %1124 = dma.done.wait [#allocation5], 512  }
  0x23   :  { %1125 = vsyncadd [#allocation5], 4294966784 }
  0x24   :  { %1126 = dma.done.wait [#allocation8], 2048  }
  0x25   :  { %1127 = vsyncadd [#allocation8], 4294965248  ;;  %v1135_v0 = vmov 0.0   ;;  %vm1136_vm0 = vmmov 0   ;;  %v1008_v1 = vld [vmem:[#allocation7 + $0x38] sm:$0xff]   ;;  %v1010_v3 = vld [vmem:[#allocation7 + $0x30] sm:$0xff]  }
  0x26   :  { %840 = vmatprep.subr.bf16.mxu1 %v1135_v0  ;;  %856 = vmatprep.mubr.msk.bf16.mxu1 %vm1136_vm0, %v1135_v0  ;;  %v1189_v2 = vld [vmem:[#allocation9 + $0x38] sm:$0xff]   ;;  %v1192_v4 = vld [vmem:[#allocation9 + $0x30] sm:$0xff]   ;;  %v1012_v5 = vld [vmem:[#allocation7 + $0x28] sm:$0xff]  }
  0x27   :  { %816 = vmatprep.subr.bf16.mxu0 %v1008_v1  ;;  %841 = vmatpush3.bf16.msra.mxu1 %v1189_v2  ;;  %v1196_v6 = vld [vmem:[#allocation9 + $0x28] sm:$0xff]   ;;  %v1014_v7 = vld [vmem:[#allocation7 + $0x20] sm:$0xff]   ;;  %v1016_v9 = vld [vmem:[#allocation7 + $0x18] sm:$0xff]  }
  0x28   :  { %817 = vmatpush3.bf16.msra.mxu0 %v1008_v1  ;;  %842 = vmatprep.subr.bf16.mxu1 %v1135_v0  ;;  %v1200_v8 = vld [vmem:[#allocation9 + $0x20] sm:$0xff]   ;;  %v1203_v10 = vld [vmem:[#allocation9 + $0x18] sm:$0xff]   ;;  %v1018_v11 = vld [vmem:[#allocation7 + $0x10] sm:$0xff]  }
  0x29   :  { %818 = vmatprep.subr.bf16.mxu0 %v1010_v3  ;;  %v1024_v12 = vld [vmem:[#allocation4] sm:$0xff]   ;;  %v1208_v13 = vld [vmem:[#allocation9 + $0x10] sm:$0xff]   ;;  %v1020_v14 = vld [vmem:[#allocation7 + $0x8] sm:$0xff]  }
  0x2a   :  { %832 = vmatprep.mubr.bf16.mxu0 %v1024_v12  ;;  %v1212_v15 = vld [vmem:[#allocation9 + $0x8] sm:$0xff]   ;;  %v1022_v16 = vld [vmem:[#allocation7] sm:$0xff]   ;;  %v1026_v21 = vld [vmem:[#allocation4 + $0x10] sm:$0xff]  }
  0x2b   :  { %843 = vmatpush3.bf16.msra.mxu1 %v1192_v4  ;;  %v1216_v17 = vld [vmem:[#allocation9] sm:$0xff]   ;;  %v1025_v20 = vld [vmem:[#allocation4 + $0x8] sm:$0xff]   ;;  %v1027_v22 = vld [vmem:[#allocation4 + $0x18] sm:$0xff]  }
  0x2c   :  { %819 = vmatpush3.bf16.msra.mxu0 %v1010_v3  ;;  %844 = vmatprep.subr.bf16.mxu1 %v1135_v0  ;;  %v710_v18 = vld [vmem:[%s1387_s4] ss:$0 sm:$0xff] }
  0x2d   :  { %820 = vmatprep.subr.bf16.mxu0 %v1012_v5  ;;  %v269_v19 = vpack.c.bf16 %v710_v18, %v710_v18  ;;  %v1266_v25 = vld [vmem:[%s1385_s2] ss:$0 sm:$0xff]  ;;  %s1137_s2 = smov [#allocation10]  }
  0x2e   :  { %s697_s10 = sshll.u32 %s1137_s2, 4  ;;  %s698_s10 = int_to_ptr.vmem [resolvable:$true] %s697_s10 }
  0x2f   :  { %845 = vmatpush3.bf16.msra.mxu1 %v1196_v6  ;;  %s1104_s11 = scalar_lea.vmem %s698_s10, 512  ;;  %p1109_p2 = scmp.lt.s32.totalorder %s698_s10, %s698_s10 }
  0x30   :  { %821 = vmatpush3.bf16.msra.mxu0 %v1012_v5  ;;  %846 = vmatprep.subr.bf16.mxu1 %v1135_v0  ;;  %p1105_p1 = scmp.ne.s32.totalorder %s698_s10, %s1104_s11  ;;  %p1110_p3 = scmp.lt.s32.totalorder %s1104_s11, %s1104_s11 }
  0x31   :  { %822 = vmatprep.subr.bf16.mxu0 %v1014_v7 }
  0x32   :  { %p1111_p4 = por %p1110_p3, %p1109_p2 }
  0x33   :  { %847 = vmatpush3.bf16.msra.mxu1 %v1200_v8 }
  0x34   :  { %823 = vmatpush3.bf16.msra.mxu0 %v1014_v7  ;;  %848 = vmatprep.subr.bf16.mxu1 %v1135_v0  ;;  %p1112_p5 = pnand %p1111_p4, %p1105_p1 }
  0x35   :  { %824 = vmatprep.subr.bf16.mxu0 %v1016_v9 }
  0x37   :  { %849 = vmatpush3.bf16.msra.mxu1 %v1203_v10 }
  0x38   :  { %825 = vmatpush3.bf16.msra.mxu0 %v1016_v9  ;;  %850 = vmatprep.subr.bf16.mxu1 %v1135_v0 }
  0x39   :  { %826 = vmatprep.subr.bf16.mxu0 %v1018_v11 }
  0x3b   :  { %851 = vmatpush3.bf16.msra.mxu1 %v1208_v13 }
  0x3c   :  { %827 = vmatpush3.bf16.msra.mxu0 %v1018_v11  ;;  %852 = vmatprep.subr.bf16.mxu1 %v1135_v0 }
  0x3d   :  { %828 = vmatprep.subr.bf16.mxu0 %v1020_v14 }
  0x3f   :  { %853 = vmatpush3.bf16.msra.mxu1 %v1212_v15 }
  0x40   :  { %829 = vmatpush3.bf16.msra.mxu0 %v1020_v14  ;;  %854 = vmatprep.subr.bf16.mxu1 %v1135_v0 }
  0x41   :  { %830 = vmatprep.subr.bf16.mxu0 %v1022_v16 }
  0x43   :  { %855 = vmatpush3.bf16.msra.mxu1 %v1216_v17 }
  0x44   :  { %831 = vmatpush3.bf16.msra.mxu0 %v1022_v16  ;;  %880 = vmatprep.subr.bf16.mxu1 %v1135_v0 }
  0x45   :  { %860 = vmatprep.subr.bf16.mxu0 %v1135_v0 }
  0x46   :  { %857 = vmatmul.mubr.bf16.vlgmr.msra.gmra.mxu1 %v269_v19 }
  0x47   :  { %833 = vmatmul.mubr.bf16.vlgmr.msra.gmra.mxu0 %v1025_v20  ;;  %881 = vmatpush3.bf16.msra.mxu1 %v1189_v2 }
  0x48   :  { %861 = vmatpush3.bf16.msra.mxu0 %v1189_v2  ;;  %882 = vmatprep.subr.bf16.mxu1 %v1135_v0 }
  0x49   :  { %862 = vmatprep.subr.bf16.mxu0 %v1135_v0  ;;  %896 = vmatprep.mubr.msk.bf16.mxu1 %vm1136_vm0, %v1135_v0 }
  0x4a   :  { %836 = vmatprep.mubr.bf16.mxu0 %v1026_v21 }
  0x4b   :  { %883 = vmatpush3.bf16.msra.mxu1 %v1192_v4 }
  0x4c   :  { %863 = vmatpush3.bf16.msra.mxu0 %v1192_v4  ;;  %884 = vmatprep.subr.bf16.mxu1 %v1135_v0 }
  0x4d   :  { %864 = vmatprep.subr.bf16.mxu0 %v1135_v0 }
  0x4f   :  { %885 = vmatpush3.bf16.msra.mxu1 %v1196_v6  ;;  %837 = vmatmul.mubr.bf16.gmra.mxu0 %v1027_v22 }
  0x50   :  { %865 = vmatpush3.bf16.msra.mxu0 %v1196_v6  ;;  %886 = vmatprep.subr.bf16.mxu1 %v1135_v0 }
  0x51   :  { %866 = vmatprep.subr.bf16.mxu0 %v1135_v0  ;;  %876 = vmatprep.mubr.msk.bf16.mxu0 %vm1136_vm0, %v1135_v0 }
  0x53   :  { %887 = vmatpush3.bf16.msra.mxu1 %v1200_v8 }
  0x54   :  { %867 = vmatpush3.bf16.msra.mxu0 %v1200_v8  ;;  %888 = vmatprep.subr.bf16.mxu1 %v1135_v0 }
  0x55   :  { %868 = vmatprep.subr.bf16.mxu0 %v1135_v0 }
  0x57   :  { %889 = vmatpush3.bf16.msra.mxu1 %v1203_v10 }
  0x58   :  { %869 = vmatpush3.bf16.msra.mxu0 %v1203_v10  ;;  %890 = vmatprep.subr.bf16.mxu1 %v1135_v0 }
  0x59   :  { %870 = vmatprep.subr.bf16.mxu0 %v1135_v0 }
  0x5b   :  { %891 = vmatpush3.bf16.msra.mxu1 %v1208_v13 }
  0x5c   :  { %871 = vmatpush3.bf16.msra.mxu0 %v1208_v13  ;;  %892 = vmatprep.subr.bf16.mxu1 %v1135_v0 }
  0x5d   :  { %872 = vmatprep.subr.bf16.mxu0 %v1135_v0 }
  0x5f   :  { %893 = vmatpush3.bf16.msra.mxu1 %v1212_v15 }
  0x60   :  { %873 = vmatpush3.bf16.msra.mxu0 %v1212_v15  ;;  %894 = vmatprep.subr.bf16.mxu1 %v1135_v0 }
  0x61   :  { %874 = vmatprep.subr.bf16.mxu0 %v1135_v0 }
  0x63   :  { %895 = vmatpush3.bf16.msra.mxu1 %v1216_v17 }
  0x64   :  { %875 = vmatpush3.bf16.msra.mxu0 %v1216_v17  ;;  %920 = vmatprep.subr.bf16.mxu1 %v1135_v0 }
  0x65   :  { %900 = vmatprep.subr.bf16.mxu0 %v1135_v0 }
 0x106   :  { %v352_v23 = vpop.f32.mrf.mxu1 }
 0x107   :  { %v1261_v24 = vpop.f32.mrf.mxu0 }
 0x108   :  { %v858_v26 = vpop.f32.mrf.mxu1  ;;  %v221_v48 = vadd.f32 %v1261_v24, %v1266_v25 }
 0x109   :  { %v212_v27 = vpop.f32.mrf.mxu0 }
 0x10a   :  { %v213_v28 = vadd.f32 %v1266_v25, %v212_v27  ;;  %v355_v29 = vpop.f32.mrf.mxu1 }
 0x10b   :  { %v835_v34 = vpop.f32.mrf.mxu0 }
 0x10c   :  { %v358_v30 = vadd.f32 %v352_v23, %v213_v28  ;;  %v859_v31 = vpop.f32.mrf.mxu1  ;;  %v224_v56 = vadd.f32 %v835_v34, %v1266_v25 }
 0x10d   :  { %v215_v35 = vpop.f32.mrf.mxu0 }
 0x10e   :  { %1028 = vtanh.f32 %v358_v30  ;;  %v216_v40 = vadd.f32 %v1266_v25, %v215_v35 }
 0x10f   :  { %v1287_v36 = vpop.f32.mrf.mxu0 }
 0x111   :  { %v1289_v37 = vpop.f32.mrf.mxu0 }
 0x112   :  { %v229_v1 = vadd.f32 %v1266_v25, %v1289_v37 }
 0x113   :  { %v1291_v38 = vpop.f32.mrf.mxu0 }
 0x114   :  { %v240_v24 = vadd.f32 %v1291_v38, %v1266_v25 }
 0x115   :  { %v1293_v39 = vpop.f32.mrf.mxu0 }
 0x11b   :  { %v1029_v32 = vpop.eup %1028 }
 0x11c   :  { %v360_v33 = vpack.c.bf16 %v1029_v32, %v1029_v32 }
 0x11e   :  { %361 = vst [vmem:[#allocation10] sm:$0xf] %v360_v33  ;;  %877 = vmatmul.mubr.bf16.vlgmr.msra.gmra.mxu0 %v360_v33 }
 0x11f   :  { %901 = vmatpush3.bf16.msra.mxu0 %v1189_v2  ;;  %916 = vmatprep.mubr.msk.bf16.mxu0 %vm1136_vm0, %v1135_v0 }
 0x120   :  { %902 = vmatprep.subr.bf16.mxu0 %v1135_v0 }
 0x123   :  { %903 = vmatpush3.bf16.msra.mxu0 %v1192_v4 }
 0x124   :  { %904 = vmatprep.subr.bf16.mxu0 %v1135_v0 }
 0x127   :  { %905 = vmatpush3.bf16.msra.mxu0 %v1196_v6 }
 0x128   :  { %906 = vmatprep.subr.bf16.mxu0 %v1135_v0 }
 0x12b   :  { %907 = vmatpush3.bf16.msra.mxu0 %v1200_v8 }
 0x12c   :  { %908 = vmatprep.subr.bf16.mxu0 %v1135_v0 }
 0x12f   :  { %909 = vmatpush3.bf16.msra.mxu0 %v1203_v10 }
 0x130   :  { %910 = vmatprep.subr.bf16.mxu0 %v1135_v0 }
 0x133   :  { %911 = vmatpush3.bf16.msra.mxu0 %v1208_v13 }
 0x134   :  { %912 = vmatprep.subr.bf16.mxu0 %v1135_v0 }
 0x137   :  { %913 = vmatpush3.bf16.msra.mxu0 %v1212_v15 }
 0x138   :  { %914 = vmatprep.subr.bf16.mxu0 %v1135_v0 }
 0x13b   :  { %915 = vmatpush3.bf16.msra.mxu0 %v1216_v17 }
 0x13c   :  { %940 = vmatprep.subr.bf16.mxu0 %v1135_v0 }
 0x1de   :  { %v398_v41 = vpop.f32.mrf.mxu0 }
 0x1df   :  { %v404_v42 = vadd.f32 %v398_v41, %v216_v40 }
 0x1e0   :  { %v878_v43 = vpop.f32.mrf.mxu0 }
 0x1e1   :  { %1030 = vtanh.f32 %v404_v42 }
 0x1e2   :  { %v401_v44 = vpop.f32.mrf.mxu0 }
 0x1e4   :  { %v879_v45 = vpop.f32.mrf.mxu0 }
 0x1ee   :  { %v1031_v46 = vpop.eup %1030 }
 0x1ef   :  { %v406_v47 = vpack.c.bf16 %v1031_v46, %v1031_v46 }
 0x1f1   :  { %408 = vst [vmem:[#allocation10 + $0x4] sm:$0xf] %v406_v47  ;;  %897 = vmatmul.mubr.bf16.vlgmr.msra.gmra.mxu1 %v406_v47 }
 0x1f2   :  { %921 = vmatpush3.bf16.msra.mxu1 %v1189_v2  ;;  %936 = vmatprep.mubr.msk.bf16.mxu1 %vm1136_vm0, %v1135_v0 }
 0x1f3   :  { %922 = vmatprep.subr.bf16.mxu1 %v1135_v0 }
 0x1f6   :  { %923 = vmatpush3.bf16.msra.mxu1 %v1192_v4 }
 0x1f7   :  { %924 = vmatprep.subr.bf16.mxu1 %v1135_v0 }
 0x1fa   :  { %925 = vmatpush3.bf16.msra.mxu1 %v1196_v6 }
 0x1fb   :  { %926 = vmatprep.subr.bf16.mxu1 %v1135_v0 }
 0x1fe   :  { %927 = vmatpush3.bf16.msra.mxu1 %v1200_v8 }
 0x1ff   :  { %928 = vmatprep.subr.bf16.mxu1 %v1135_v0 }
 0x202   :  { %929 = vmatpush3.bf16.msra.mxu1 %v1203_v10 }
 0x203   :  { %930 = vmatprep.subr.bf16.mxu1 %v1135_v0 }
 0x206   :  { %931 = vmatpush3.bf16.msra.mxu1 %v1208_v13 }
 0x207   :  { %932 = vmatprep.subr.bf16.mxu1 %v1135_v0 }
 0x20a   :  { %933 = vmatpush3.bf16.msra.mxu1 %v1212_v15 }
 0x20b   :  { %934 = vmatprep.subr.bf16.mxu1 %v1135_v0 }
 0x20e   :  { %935 = vmatpush3.bf16.msra.mxu1 %v1216_v17 }
 0x20f   :  { %960 = vmatprep.subr.bf16.mxu1 %v1135_v0 }
 0x2b1   :  { %v445_v49 = vpop.f32.mrf.mxu1 }
 0x2b2   :  { %v451_v50 = vadd.f32 %v445_v49, %v221_v48 }
 0x2b3   :  { %v898_v51 = vpop.f32.mrf.mxu1 }
 0x2b4   :  { %1032 = vtanh.f32 %v451_v50 }
 0x2b5   :  { %v448_v52 = vpop.f32.mrf.mxu1 }
 0x2b7   :  { %v899_v53 = vpop.f32.mrf.mxu1 }
 0x2c1   :  { %v1033_v54 = vpop.eup %1032 }
 0x2c2   :  { %v453_v55 = vpack.c.bf16 %v1033_v54, %v1033_v54 }
 0x2c4   :  { %455 = vst [vmem:[#allocation10 + $0x8] sm:$0xf] %v453_v55  ;;  %917 = vmatmul.mubr.bf16.vlgmr.msra.gmra.mxu0 %v453_v55 }
 0x2c5   :  { %941 = vmatpush3.bf16.msra.mxu0 %v1189_v2  ;;  %956 = vmatprep.mubr.msk.bf16.mxu0 %vm1136_vm0, %v1135_v0 }
 0x2c6   :  { %942 = vmatprep.subr.bf16.mxu0 %v1135_v0 }
 0x2c9   :  { %943 = vmatpush3.bf16.msra.mxu0 %v1192_v4 }
 0x2ca   :  { %944 = vmatprep.subr.bf16.mxu0 %v1135_v0 }
 0x2cd   :  { %945 = vmatpush3.bf16.msra.mxu0 %v1196_v6 }
 0x2ce   :  { %946 = vmatprep.subr.bf16.mxu0 %v1135_v0 }
 0x2d1   :  { %947 = vmatpush3.bf16.msra.mxu0 %v1200_v8 }
 0x2d2   :  { %948 = vmatprep.subr.bf16.mxu0 %v1135_v0 }
 0x2d5   :  { %949 = vmatpush3.bf16.msra.mxu0 %v1203_v10 }
 0x2d6   :  { %950 = vmatprep.subr.bf16.mxu0 %v1135_v0 }
 0x2d9   :  { %951 = vmatpush3.bf16.msra.mxu0 %v1208_v13 }
 0x2da   :  { %952 = vmatprep.subr.bf16.mxu0 %v1135_v0 }
 0x2dd   :  { %953 = vmatpush3.bf16.msra.mxu0 %v1212_v15 }
 0x2de   :  { %954 = vmatprep.subr.bf16.mxu0 %v1135_v0 }
 0x2e1   :  { %955 = vmatpush3.bf16.msra.mxu0 %v1216_v17 }
 0x2e2   :  { %980 = vmatprep.subr.bf16.mxu0 %v1135_v0 }
 0x384   :  { %v492_v57 = vpop.f32.mrf.mxu0 }
 0x385   :  { %v498_v58 = vadd.f32 %v492_v57, %v224_v56 }
 0x386   :  { %v918_v59 = vpop.f32.mrf.mxu0 }
 0x387   :  { %1034 = vtanh.f32 %v498_v58 }
 0x388   :  { %v495_v60 = vpop.f32.mrf.mxu0 }
 0x38a   :  { %v919_v61 = vpop.f32.mrf.mxu0 }
 0x394   :  { %v1035_v62 = vpop.eup %1034 }
 0x395   :  { %v500_v63 = vpack.c.bf16 %v1035_v62, %v1035_v62 }
 0x397   :  { %502 = vst [vmem:[#allocation10 + $0xc] sm:$0xf] %v500_v63  ;;  %937 = vmatmul.mubr.bf16.vlgmr.msra.gmra.mxu1 %v500_v63 }
 0x398   :  { %961 = vmatpush3.bf16.msra.mxu1 %v1189_v2  ;;  %976 = vmatprep.mubr.msk.bf16.mxu1 %vm1136_vm0, %v1135_v0 }
 0x399   :  { %962 = vmatprep.subr.bf16.mxu1 %v1135_v0 }
 0x39c   :  { %963 = vmatpush3.bf16.msra.mxu1 %v1192_v4 }
 0x39d   :  { %964 = vmatprep.subr.bf16.mxu1 %v1135_v0 }
 0x3a0   :  { %965 = vmatpush3.bf16.msra.mxu1 %v1196_v6 }
 0x3a1   :  { %966 = vmatprep.subr.bf16.mxu1 %v1135_v0 }
 0x3a4   :  { %967 = vmatpush3.bf16.msra.mxu1 %v1200_v8 }
 0x3a5   :  { %968 = vmatprep.subr.bf16.mxu1 %v1135_v0 }
 0x3a8   :  { %969 = vmatpush3.bf16.msra.mxu1 %v1203_v10 }
 0x3a9   :  { %970 = vmatprep.subr.bf16.mxu1 %v1135_v0 }
 0x3ac   :  { %971 = vmatpush3.bf16.msra.mxu1 %v1208_v13 }
 0x3ad   :  { %972 = vmatprep.subr.bf16.mxu1 %v1135_v0 }
 0x3b0   :  { %973 = vmatpush3.bf16.msra.mxu1 %v1212_v15 }
 0x3b1   :  { %974 = vmatprep.subr.bf16.mxu1 %v1135_v0 }
 0x3b4   :  { %975 = vmatpush3.bf16.msra.mxu1 %v1216_v17 }
 0x457   :  { %v539_v3 = vpop.f32.mrf.mxu1 }
 0x458   :  { %v545_v5 = vadd.f32 %v539_v3, %v229_v1 }
 0x459   :  { %v938_v7 = vpop.f32.mrf.mxu1 }
 0x45a   :  { %1036 = vtanh.f32 %v545_v5 }
 0x45b   :  { %v542_v9 = vpop.f32.mrf.mxu1 }
 0x45d   :  { %v939_v11 = vpop.f32.mrf.mxu1 }
 0x467   :  { %v1037_v12 = vpop.eup %1036 }
 0x468   :  { %v547_v14 = vpack.c.bf16 %v1037_v12, %v1037_v12 }
 0x46a   :  { %549 = vst [vmem:[#allocation10 + $0x10] sm:$0xf] %v547_v14  ;;  %957 = vmatmul.mubr.bf16.vlgmr.msra.gmra.mxu0 %v547_v14 }
 0x46b   :  { %981 = vmatpush3.bf16.msra.mxu0 %v1189_v2  ;;  %996 = vmatprep.mubr.msk.bf16.mxu0 %vm1136_vm0, %v1135_v0  ;;  %v232_v2 = vadd.f32 %v1266_v25, %v1293_v39 }
 0x46c   :  { %982 = vmatprep.subr.bf16.mxu0 %v1135_v0 }
 0x46f   :  { %983 = vmatpush3.bf16.msra.mxu0 %v1192_v4 }
 0x470   :  { %984 = vmatprep.subr.bf16.mxu0 %v1135_v0 }
 0x473   :  { %985 = vmatpush3.bf16.msra.mxu0 %v1196_v6 }
 0x474   :  { %986 = vmatprep.subr.bf16.mxu0 %v1135_v0 }
 0x477   :  { %987 = vmatpush3.bf16.msra.mxu0 %v1200_v8 }
 0x478   :  { %988 = vmatprep.subr.bf16.mxu0 %v1135_v0 }
 0x47b   :  { %989 = vmatpush3.bf16.msra.mxu0 %v1203_v10 }
 0x47c   :  { %990 = vmatprep.subr.bf16.mxu0 %v1135_v0 }
 0x47f   :  { %991 = vmatpush3.bf16.msra.mxu0 %v1208_v13  ;;  %v237_v13 = vadd.f32 %v1287_v36, %v1266_v25 }
 0x480   :  { %992 = vmatprep.subr.bf16.mxu0 %v1135_v0 }
 0x483   :  { %993 = vmatpush3.bf16.msra.mxu0 %v1212_v15 }
 0x484   :  { %994 = vmatprep.subr.bf16.mxu0 %v1135_v0 }
 0x487   :  { %995 = vmatpush3.bf16.msra.mxu0 %v1216_v17 }
 0x52a   :  { %v586_v4 = vpop.f32.mrf.mxu0 }
 0x52b   :  { %v592_v6 = vadd.f32 %v586_v4, %v232_v2 }
 0x52c   :  { %v958_v8 = vpop.f32.mrf.mxu0 }
 0x52d   :  { %1038 = vtanh.f32 %v592_v6 }
 0x52e   :  { %v589_v10 = vpop.f32.mrf.mxu0 }
 0x530   :  { %v959_v16 = vpop.f32.mrf.mxu0 }
 0x53a   :  { %v1039_v18 = vpop.eup %1038 }
 0x53b   :  { %v594_v19 = vpack.c.bf16 %v1039_v18, %v1039_v18 }
 0x53d   :  { %596 = vst [vmem:[#allocation10 + $0x14] sm:$0xf] %v594_v19  ;;  %977 = vmatmul.mubr.bf16.vlgmr.msra.gmra.mxu1 %v594_v19 }
 0x5fd   :  { %v633_v15 = vpop.f32.mrf.mxu1 }
 0x5fe   :  { %v639_v0 = vadd.f32 %v633_v15, %v237_v13 }
 0x5ff   :  { %v978_v20 = vpop.f32.mrf.mxu1 }
 0x600   :  { %1040 = vtanh.f32 %v639_v0 }
 0x601   :  { %v636_v17 = vpop.f32.mrf.mxu1 }
 0x603   :  { %v979_v21 = vpop.f32.mrf.mxu1 }
 0x60d   :  { %v1041_v22 = vpop.eup %1040 }
 0x60e   :  { %v641_v23 = vpack.c.bf16 %v1041_v22, %v1041_v22 }
 0x610   :  { %643 = vst [vmem:[#allocation10 + $0x18] sm:$0xf] %v641_v23  ;;  %997 = vmatmul.mubr.bf16.vlgmr.msra.gmra.mxu0 %v641_v23 }
 0x6d0   :  { %v680_v26 = vpop.f32.mrf.mxu0 }
 0x6d1   :  { %v686_v27 = vadd.f32 %v680_v26, %v240_v24 }
 0x6d2   :  { %v998_v28 = vpop.f32.mrf.mxu0 }
 0x6d3   :  { %1042 = vtanh.f32 %v686_v27 }
 0x6d4   :  { %v683_v29 = vpop.f32.mrf.mxu0 }
 0x6d6   :  { %v999_v30 = vpop.f32.mrf.mxu0 }
 0x6e0   :  { %v1043_v31 = vpop.eup %1042 }
 0x6e1   :  { %v688_v32 = vpack.c.bf16 %v1043_v31, %v1043_v31 }
 0x6e3   :  { %690 = vst [vmem:[#allocation10 + $0x1c] sm:$0xf] %v688_v32 }
 0x6e4   :  { %1115 = shalt.err (!%p1112_p5)
}
 0x6e5   :  { %703 = dma.vmem_to_hbm [thread:$0]  %s698_s10, 512, %s1388_s5, [#allocation6], %s1132_s23, %s1132_s23, %s1133_s24  }
 0x6e6   :  { %1128 = dma.done.wait [#allocation6], 512  }
 0x6e7   :  { %1129 = vsyncadd [#allocation6], 4294966784 }
 0x6e8   :  { %707 = vsyncpa [#allocation5], 1 }
 0x6e9   :  { %708 = vsyncpa [#allocation8], 1 }
 0x6ea   :  { %709 = vsyncpa [#allocation6], 1 }

</bundles_post_ra>
